<compile_context>
chip_gen: v5e
topology: v5e:2x2
jax: 0.10.0
libtpu: 0.0.40
codegen_flags: <defaults>
</compile_context>

<pallas_src>
import jax
import jax.numpy as jnp
from jax.experimental import pallas as pl
from jax.experimental.pallas import tpu as pltpu


def _round_up(n, m):
    return ((n + m - 1) // m) * m


def _hca_kernel(seq_ref, user_ref, mask_ref,
                w1t_ref, b1_ref, w2t_ref, b2_ref,
                out_ref):
    TB, S, E = seq_ref.shape

    seq3 = seq_ref[...]                                   # (TB, S, E) f32
    seq2 = seq3.reshape(TB * S, E)                        # free re-view (S % 8 == 0)

    # w1(seq): (TB*S, E) @ (E, E) on the MXU
    h1 = jnp.dot(seq2, w1t_ref[...],
                 preferred_element_type=jnp.float32) + b1_ref[...]
    # w2(user): (TB, E) @ (E, E)
    h2 = jnp.dot(user_ref[...], w2t_ref[...],
                 preferred_element_type=jnp.float32) + b2_ref[...]

    # sigmoid(w1(seq) + w2(user)) summed over the embedding lanes (XLU reduce).
    sig = jax.nn.sigmoid(h1.reshape(TB, S, E) + h2[:, None, :])      # (TB, S, E)
    scores = jnp.sum(sig, axis=2)                                     # (TB, S)

    # masked_fill_(mask, -1e9)
    scores = jnp.where(mask_ref[...] != 0, jnp.float32(-1.0e9), scores)

    # numerically stable softmax over seq_len
    m = jnp.max(scores, axis=-1, keepdims=True)
    e = jnp.exp(scores - m)
    l = jnp.sum(e, axis=-1, keepdims=True)                            # (TB, 1)
    # Exact reciprocal on a (TB,1) tensor (negligible); approx=True EUP recip is
    # available but kept exact so the f32 reference check stays at 1e-5.
    p = e * (1.0 / l)                                                 # (TB, S)

    # Weighted sum of the original seq embeddings over seq_len.
    if S >= 128:
        # Enough contraction depth to be worth the MXU.
        out = jnp.einsum('bqs,bse->bqe', p[:, None, :], seq3,
                         preferred_element_type=jnp.float32)[:, 0, :]
    else:
        # Small S: an M=1/K=S batched matmul underfills the MXU; the VPU
        # broadcast-multiply-reduce over a tiny (TB,S,E) temporary is cheaper.
        out = jnp.sum(p[:, :, None] * seq3, axis=1)                   # (TB, E)

    out_ref[...] = out.astype(out_ref.dtype)


def hierarchical_cate_attention(seq_cate_embedding, user_embedding, mask,
                                w1, b1, w2, b2, *, batch_tile=64):
    """seq: (B,S,E), user: (B,E), mask: (B,S) int/bool (nonzero == masked) or
    None. w1, w2: PyTorch-style Linear weights (E_out, E_in); b1, b2: (E,)."""
    B, S, E = seq_cate_embedding.shape
    f32 = jnp.float32

    # --- tiling choices -----------------------------------------------------
    S_pad = _round_up(S, 8)                       # keeps the in-kernel reshape free
    # Clamp TB so one seq tile stays <= ~8 MiB (safe double-buffered on v7x too).
    bytes_per_batch_row = S_pad * E * 4
    max_tb_by_vmem = max(8, ((8 * 1024 * 1024) // max(bytes_per_batch_row, 1)) // 8 * 8)
    TB = min(batch_tile, max_tb_by_vmem, _round_up(B, 8))
    TB = max(8, (TB // 8) * 8)
    B_pad = _round_up(B, TB)
    nb = B_pad // TB

    # --- inputs (pad only when actually needed; no embedding-dim padding) ---
    if mask is None:
        mask_core = jnp.zeros((B, S), jnp.int32)
    else:
        mask_core = mask.astype(jnp.int32)

    seq_f = seq_cate_embedding.astype(f32)
    user_f = user_embedding.astype(f32)

    if (B_pad, S_pad) == (B, S):
        seq_p = seq_f
        mask_p = mask_core
    else:
        seq_p = jnp.zeros((B_pad, S_pad, E), f32).at[:B, :S, :].set(seq_f)
        # Padded seq positions are masked (-1e9) so they get ~zero softmax weight.
        mask_p = jnp.ones((B_pad, S_pad), jnp.int32).at[:B, :S].set(mask_core)

    user_p = user_f if B_pad == B else jnp.zeros((B_pad, E), f32).at[:B].set(user_f)

    # PyTorch Linear weight layout is (E_out, E_in); pre-transpose so the kernel
    # does x @ W_t + b.  No padding — Mosaic handles the small dims internally.
    w1t = jnp.transpose(w1).astype(f32)           # (E, E)
    w2t = jnp.transpose(w2).astype(f32)           # (E, E)
    b1_p = b1.astype(f32).reshape(1, E)
    b2_p = b2.astype(f32).reshape(1, E)

    grid_spec = pltpu.PrefetchScalarGridSpec(
        num_scalar_prefetch=0,
        grid=(nb,),
        in_specs=[
            pl.BlockSpec((TB, S_pad, E), lambda b: (b, 0, 0)),   # seq  (streamed)
            pl.BlockSpec((TB, E),        lambda b: (b, 0)),      # user (streamed)
            pl.BlockSpec((TB, S_pad),    lambda b: (b, 0)),      # mask (streamed)
            pl.BlockSpec((E, E),         lambda b: (0, 0)),      # w1t  (resident)
            pl.BlockSpec((1, E),         lambda b: (0, 0)),      # b1   (resident)
            pl.BlockSpec((E, E),         lambda b: (0, 0)),      # w2t  (resident)
            pl.BlockSpec((1, E),         lambda b: (0, 0)),      # b2   (resident)
        ],
        out_specs=pl.BlockSpec((TB, E), lambda b: (b, 0)),
    )

    # VMEM budget derived from the actual tile sizes (double-buffered inputs +
    # elementwise-temporary headroom), capped at 48 MiB so it fits v7x's 64 MiB.
    tile_io_bytes = 4 * (2 * TB * S_pad * E          # seq (2 buffers)
                         + 2 * TB * E                # user
                         + 2 * TB * S_pad            # mask
                         + 2 * 2 * E * E             # w1t, w2t
                         + 2 * 2 * E                 # b1, b2
                         + 2 * TB * E)               # out
    scratch_bytes = 4 * 4 * TB * S_pad * E           # sig/h1/etc. temporaries
    vmem_limit = int(min(max(2 * (tile_io_bytes + scratch_bytes),
                             16 * 1024 * 1024), 48 * 1024 * 1024))

    flops = int(2 * B_pad * S_pad * E * E            # w1 matmul
                + 2 * B_pad * E * E                  # w2 matmul
                + 2 * B_pad * S_pad * E)             # weighted sum
    transcendentals = int(B_pad * S_pad * E + B_pad * S_pad)   # sigmoid + exp
    bytes_accessed = int(4 * (B_pad * S_pad * E + 2 * B_pad * E + B_pad * S_pad
                              + 2 * E * E + 2 * E))

    out_p = pl.pallas_call(
        _hca_kernel,
        out_shape=jax.ShapeDtypeStruct((B_pad, E), jnp.float32),
        grid_spec=grid_spec,
        compiler_params=pltpu.CompilerParams(
            dimension_semantics=("parallel",),       # batch rows are independent
            vmem_limit_bytes=vmem_limit,
        ),
        cost_estimate=pl.CostEstimate(
            flops=flops,
            transcendentals=transcendentals,
            bytes_accessed=bytes_accessed),
    )(seq_p, user_p, mask_p, w1t, b1_p, w2t, b2_p)

    return out_p[:B, :E]


def _reference(seq, user, mask, w1, b1, w2, b2):
    h1 = jnp.einsum('bse,fe->bsf', seq, w1) + b1
    h2 = jnp.einsum('be,fe->bf', user, w2) + b2
    scores = jax.nn.sigmoid(h1 + h2[:, None, :]).sum(axis=2)
    scores = jnp.where(mask != 0, -1.0e9, scores)
    p = jax.nn.softmax(scores, axis=-1)
    return jnp.sum(p[:, :, None] * seq, axis=1)


if __name__ == "__main__":
    key = jax.random.PRNGKey(0)
    k1, k2, k3, k4, k5, k6, k7, k8, k9 = jax.random.split(key, 9)

    E = 32
    scale = 1.0 / jnp.sqrt(jnp.float32(E))
    w1 = jax.random.uniform(k3, (E, E), jnp.float32, -scale, scale)
    b1 = jax.random.uniform(k4, (E,), jnp.float32, -scale, scale)
    w2 = jax.random.uniform(k5, (E, E), jnp.float32, -scale, scale)
    b2 = jax.random.uniform(k6, (E,), jnp.float32, -scale, scale)

    # ---- small module-sized test: B=2, S=8, E=32 (single grid step) ----
    B, S = 2, 8
    seq = jax.random.normal(k1, (B, S, E), dtype=jnp.float32)
    user = jax.random.normal(k2, (B, E), dtype=jnp.float32)
    mask = jnp.zeros((B, S), dtype=jnp.int32).at[1, -2:].set(1)

    out = jax.block_until_ready(
        hierarchical_cate_attention(seq, user, mask, w1, b1, w2, b2))
    ref = _reference(seq, user, mask, w1, b1, w2, b2)
    assert out.shape == (B, E)
    assert jnp.allclose(out, ref, atol=1e-5, rtol=1e-5), "mismatch vs reference (B=2)"

    # ---- larger test: B=160, S=12 -> batch padding, S padding, 3 grid steps ----
    B2, S2 = 160, 12
    seq2 = jax.random.normal(k7, (B2, S2, E), dtype=jnp.float32)
    user2 = jax.random.normal(k8, (B2, E), dtype=jnp.float32)
    mask2 = jax.random.bernoulli(k9, 0.25, (B2, S2)).astype(jnp.int32)
    mask2 = mask2.at[:, 0].set(0)   # guarantee at least one unmasked position per row

    out2 = jax.block_until_ready(
        hierarchical_cate_attention(seq2, user2, mask2, w1, b1, w2, b2))
    ref2 = _reference(seq2, user2, mask2, w1, b1, w2, b2)
    assert out2.shape == (B2, E)
    assert jnp.allclose(out2, ref2, atol=1e-5, rtol=1e-5), "mismatch vs reference (B=160)"

    # ---- mask=None path ----
    out3 = jax.block_until_ready(
        hierarchical_cate_attention(seq, user, None, w1, b1, w2, b2))
    ref3 = _reference(seq, user, jnp.zeros((B, S), jnp.int32), w1, b1, w2, b2)
    assert jnp.allclose(out3, ref3, atol=1e-5, rtol=1e-5), "mismatch vs reference (mask=None)"

    print("KERNEL_OK")
</pallas_src>

<mosaic_0001>
module attributes {stable_mosaic.version = 11 : i64} {
  func.func @_hca_kernel(%arg0: i32, %arg1: memref<8x8x32xf32, #tpu.memory_space<vmem>>, %arg2: memref<8x32xf32, #tpu.memory_space<vmem>>, %arg3: memref<8x8xi32, #tpu.memory_space<vmem>>, %arg4: memref<32x32xf32, #tpu.memory_space<vmem>>, %arg5: memref<1x32xf32, #tpu.memory_space<vmem>>, %arg6: memref<32x32xf32, #tpu.memory_space<vmem>>, %arg7: memref<1x32xf32, #tpu.memory_space<vmem>>, %arg8: memref<8x32xf32, #tpu.memory_space<vmem>>) attributes {dimension_semantics = [#tpu.dimension_semantics<parallel>], iteration_bounds = array<i64: 1>, scalar_prefetch = 0 : i64, scratch_operands = 0 : i64, tpu.core_type = #tpu.core_type<tc>, window_params = [{transform_indices = @transform_0, window_bounds = array<i64: 8, 8, 32>}, {transform_indices = @transform_1, window_bounds = array<i64: 8, 32>}, {transform_indices = @transform_2, window_bounds = array<i64: 8, 8>}, {pipeline_mode = #tpu.pipeline_mode<synchronous>, transform_indices = @transform_3, window_bounds = array<i64: 32, 32>}, {pipeline_mode = #tpu.pipeline_mode<synchronous>, transform_indices = @transform_4, window_bounds = array<i64: 1, 32>}, {pipeline_mode = #tpu.pipeline_mode<synchronous>, transform_indices = @transform_5, window_bounds = array<i64: 32, 32>}, {pipeline_mode = #tpu.pipeline_mode<synchronous>, transform_indices = @transform_6, window_bounds = array<i64: 1, 32>}, {transform_indices = @transform_7, window_bounds = array<i64: 8, 32>}]} {
    %c0 = arith.constant 0 : index
    %c0_0 = arith.constant 0 : index
    %c0_1 = arith.constant 0 : index
    %0 = vector.load %arg1[%c0, %c0_0, %c0_1] : memref<8x8x32xf32, #tpu.memory_space<vmem>>, vector<8x8x32xf32>
    %1 = vector.shape_cast %0 : vector<8x8x32xf32> to vector<64x32xf32>
    %c0_2 = arith.constant 0 : index
    %c0_3 = arith.constant 0 : index
    %2 = vector.load %arg4[%c0_2, %c0_3] : memref<32x32xf32, #tpu.memory_space<vmem>>, vector<32x32xf32>
    %cst = arith.constant dense<0.000000e+00> : vector<64x32xf32>
    %3 = tpu.matmul %1, %2, %cst {dimension_numbers = #tpu.dot_dimension_numbers<[1], [0], [0], [1], [0, 0, 1, 1], [], []>} : vector<64x32xf32>, vector<32x32xf32>, vector<64x32xf32> -> vector<64x32xf32>
    %c0_4 = arith.constant 0 : index
    %c0_5 = arith.constant 0 : index
    %4 = vector.load %arg5[%c0_4, %c0_5] : memref<1x32xf32, #tpu.memory_space<vmem>>, vector<1x32xf32>
    %5 = vector.broadcast %4 : vector<1x32xf32> to vector<64x32xf32>
    %6 = arith.addf %3, %5 : vector<64x32xf32>
    %c0_6 = arith.constant 0 : index
    %c0_7 = arith.constant 0 : index
    %7 = vector.load %arg2[%c0_6, %c0_7] : memref<8x32xf32, #tpu.memory_space<vmem>>, vector<8x32xf32>
    %c0_8 = arith.constant 0 : index
    %c0_9 = arith.constant 0 : index
    %8 = vector.load %arg6[%c0_8, %c0_9] : memref<32x32xf32, #tpu.memory_space<vmem>>, vector<32x32xf32>
    %cst_10 = arith.constant dense<0.000000e+00> : vector<8x32xf32>
    %9 = tpu.matmul %7, %8, %cst_10 {dimension_numbers = #tpu.dot_dimension_numbers<[1], [0], [0], [1], [0, 0, 1, 1], [], []>} : vector<8x32xf32>, vector<32x32xf32>, vector<8x32xf32> -> vector<8x32xf32>
    %c0_11 = arith.constant 0 : index
    %c0_12 = arith.constant 0 : index
    %10 = vector.load %arg7[%c0_11, %c0_12] : memref<1x32xf32, #tpu.memory_space<vmem>>, vector<1x32xf32>
    %11 = vector.broadcast %10 : vector<1x32xf32> to vector<8x32xf32>
    %12 = arith.addf %9, %11 : vector<8x32xf32>
    %13 = vector.shape_cast %6 : vector<64x32xf32> to vector<8x8x32xf32>
    %14 = vector.shape_cast %12 : vector<8x32xf32> to vector<8x1x32xf32>
    %15 = vector.broadcast %14 : vector<8x1x32xf32> to vector<8x8x32xf32>
    %16 = arith.addf %13, %15 : vector<8x8x32xf32>
    %17 = arith.negf %16 : vector<8x8x32xf32>
    %18 = math.exp %17 : vector<8x8x32xf32>
    %cst_13 = arith.constant 1.000000e+00 : f32
    %19 = vector.broadcast %cst_13 : f32 to vector<8x8x32xf32>
    %20 = arith.addf %19, %18 : vector<8x8x32xf32>
    %21 = arith.divf %19, %20 : vector<8x8x32xf32>
    %cst_14 = arith.constant dense<0.000000e+00> : vector<8x8xf32>
    %22 = vector.multi_reduction <add>, %21, %cst_14 [2] : vector<8x8x32xf32> to vector<8x8xf32>
    %c0_15 = arith.constant 0 : index
    %c0_16 = arith.constant 0 : index
    %23 = vector.load %arg3[%c0_15, %c0_16] : memref<8x8xi32, #tpu.memory_space<vmem>>, vector<8x8xi32>
    %c0_i32 = arith.constant 0 : i32
    %24 = vector.broadcast %c0_i32 : i32 to vector<8x8xi32>
    %25 = arith.cmpi ne, %23, %24 : vector<8x8xi32>
    %cst_17 = arith.constant -1.000000e+09 : f32
    %26 = vector.broadcast %cst_17 : f32 to vector<8x8xf32>
    %27 = arith.select %25, %26, %22 : vector<8x8xi1>, vector<8x8xf32>
    %cst_18 = arith.constant dense<0xFF800000> : vector<8xf32>
    %28 = vector.multi_reduction <maximumf>, %27, %cst_18 [1] : vector<8x8xf32> to vector<8xf32>
    %29 = vector.shape_cast %28 : vector<8xf32> to vector<8x1xf32>
    %30 = vector.broadcast %29 : vector<8x1xf32> to vector<8x8xf32>
    %31 = arith.subf %27, %30 : vector<8x8xf32>
    %32 = math.exp %31 : vector<8x8xf32>
    %cst_19 = arith.constant dense<0.000000e+00> : vector<8xf32>
    %33 = vector.multi_reduction <add>, %32, %cst_19 [1] : vector<8x8xf32> to vector<8xf32>
    %34 = vector.shape_cast %33 : vector<8xf32> to vector<8x1xf32>
    %cst_20 = arith.constant 1.000000e+00 : f32
    %35 = vector.broadcast %cst_20 : f32 to vector<8x1xf32>
    %36 = arith.divf %35, %34 : vector<8x1xf32>
    %37 = vector.broadcast %36 : vector<8x1xf32> to vector<8x8xf32>
    %38 = arith.mulf %32, %37 : vector<8x8xf32>
    %39 = vector.shape_cast %38 : vector<8x8xf32> to vector<8x8x1xf32>
    %40 = vector.broadcast %39 : vector<8x8x1xf32> to vector<8x8x32xf32>
    %41 = arith.mulf %40, %0 : vector<8x8x32xf32>
    %cst_21 = arith.constant dense<0.000000e+00> : vector<8x32xf32>
    %42 = vector.multi_reduction <add>, %41, %cst_21 [1] : vector<8x8x32xf32> to vector<8x32xf32>
    %c0_22 = arith.constant 0 : index
    %c0_23 = arith.constant 0 : index
    %43 = vector.load %arg8[%c0_22, %c0_23] : memref<8x32xf32, #tpu.memory_space<vmem>>, vector<8x32xf32>
    tpu.vector_store %arg8[%c0_22, %c0_23], %42 {strides = array<i32>} : memref<8x32xf32, #tpu.memory_space<vmem>>, vector<8x32xf32>,
    return
  }
  func.func @transform_0(%arg0: i32) -> (i32, i32, i32) {
    %c0_i32 = arith.constant 0 : i32
    %c0_i32_0 = arith.constant 0 : i32
    %c0_i32_1 = arith.constant 0 : i32
    return %arg0, %c0_i32, %c0_i32_0 : i32, i32, i32
  }
  func.func @transform_1(%arg0: i32) -> (i32, i32) {
    %c0_i32 = arith.constant 0 : i32
    %c0_i32_0 = arith.constant 0 : i32
    return %arg0, %c0_i32 : i32, i32
  }
  func.func @transform_2(%arg0: i32) -> (i32, i32) {
    %c0_i32 = arith.constant 0 : i32
    %c0_i32_0 = arith.constant 0 : i32
    return %arg0, %c0_i32 : i32, i32
  }
  func.func @transform_3(%arg0: i32) -> (i32, i32) {
    %c0_i32 = arith.constant 0 : i32
    %c0_i32_0 = arith.constant 0 : i32
    %c0_i32_1 = arith.constant 0 : i32
    return %c0_i32, %c0_i32_0 : i32, i32
  }
  func.func @transform_4(%arg0: i32) -> (i32, i32) {
    %c0_i32 = arith.constant 0 : i32
    %c0_i32_0 = arith.constant 0 : i32
    %c0_i32_1 = arith.constant 0 : i32
    return %c0_i32, %c0_i32_0 : i32, i32
  }
  func.func @transform_5(%arg0: i32) -> (i32, i32) {
    %c0_i32 = arith.constant 0 : i32
    %c0_i32_0 = arith.constant 0 : i32
    %c0_i32_1 = arith.constant 0 : i32
    return %c0_i32, %c0_i32_0 : i32, i32
  }
  func.func @transform_6(%arg0: i32) -> (i32, i32) {
    %c0_i32 = arith.constant 0 : i32
    %c0_i32_0 = arith.constant 0 : i32
    %c0_i32_1 = arith.constant 0 : i32
    return %c0_i32, %c0_i32_0 : i32, i32
  }
  func.func @transform_7(%arg0: i32) -> (i32, i32) {
    %c0_i32 = arith.constant 0 : i32
    %c0_i32_0 = arith.constant 0 : i32
    return %arg0, %c0_i32 : i32, i32
  }
}

</mosaic_0001>

<bundles_post_ra>
// kernel: tpu_custom_call.1
= control target key start
LH: loop header
LB: loop body
LE: loop exit
PB: predicated region body
PF: predicated region fallthrough
CT: control target
= control target key end

     0   :  { %12 = vsyncpa [#allocation3], 0  ;;  %s1116_s0 = inlined_call_operand.hbm [shape: f32[8,8,32], index: 0, kind: input, shape index: {}]   ;;  %s1117_s1 = inlined_call_operand.hbm [shape: f32[8,32], index: 1, kind: input, shape index: {}]   ;;  %s1118_s2 = inlined_call_operand.hbm [shape: s32[8,8], index: 2, kind: input, shape index: {}]   ;;  %s1119_s3 = inlined_call_operand.hbm [shape: f32[32,32], index: 3, kind: input, shape index: {}]   ;;  %s1120_s4 = inlined_call_operand.vmem [shape: f32[1,32], index: 4, kind: input, shape index: {}]   ;;  %s1121_s5 = inlined_call_operand.hbm [shape: f32[32,32], index: 5, kind: input, shape index: {}]   ;;  %s1122_s6 = inlined_call_operand.vmem [shape: f32[1,32], index: 6, kind: input, shape index: {}]   ;;  %s1123_s7 = inlined_call_operand.hbm [shape: f32[8,32], index: 7, kind: output, shape index: {}]  }
   0x1   :  { %13 = vsyncpa [#allocation6], 0 }
   0x2   :  { %14 = vsyncpa [#allocation9], 0  ;;  %s34_s26 = sshll.u32 %s1117_s1, 4  ;;  %s35_s26 = int_to_ptr.hbm [resolvable:$true] %s34_s26 }
   0x3   :  { %15 = vsyncpa [#allocation4], 0  ;;  %s867_s27 = smov [#allocation5]   ;;  %s55_s8 = sshll.u32 %s1119_s3, 4  ;;  %s56_s8 = int_to_ptr.hbm [resolvable:$true] %s55_s8 }
   0x4   :  { %s36_s28 = sshll.u32 %s867_s27, 4  ;;  %s868_s9 = smov [#allocation8]   ;;  %s37_s28 = int_to_ptr.vmem [resolvable:$true] %s36_s28 }
   0x5   :  { %39 = dma.hbm_to_vmem [thread:$0]  %s35_s26, 128, %s37_s28, [#allocation6]  }
   0x6   :  { %s57_s10 = sshll.u32 %s868_s9, 4  ;;  %s20_s13 = sshll.u32 %s1116_s0, 4  ;;  %s58_s10 = int_to_ptr.vmem [resolvable:$true] %s57_s10  ;;  %s21_s13 = int_to_ptr.hbm [resolvable:$true] %s20_s13 }
   0x7   :  { %s869_s1 = smov 128   ;;  %s870_s14 = smov 8  }
   0x8   :  { %63 = dma.hbm_to_vmem [thread:$0]  %s56_s8, 512, %s58_s10, [#allocation9], %s869_s1, %s869_s1, %s870_s14  }
   0x9   :  { %s45_s17 = sshll.u32 %s1118_s2, 4  ;;  %s871_s18 = smov [#allocation2]   ;;  %s46_s17 = int_to_ptr.hbm [resolvable:$true] %s45_s17 }
   0xa   :  { %s22_s19 = sshll.u32 %s871_s18, 4  ;;  %s872_s3 = smov [#allocation7]   ;;  %s23_s19 = int_to_ptr.vmem [resolvable:$true] %s22_s19 }
   0xb   :  { %28 = dma.hbm_to_vmem [thread:$0]  %s21_s13, 1024, %s23_s19, [#allocation3], %s869_s1, %s869_s1, %s870_s14  }
   0xc   :  { %s47_s20 = sshll.u32 %s872_s3, 4  ;;  %s70_s0 = sshll.u32 %s1121_s5, 4  ;;  %s48_s20 = int_to_ptr.vmem [resolvable:$true] %s47_s20  ;;  %s71_s0 = int_to_ptr.hbm [resolvable:$true] %s70_s0 }
   0xd   :  { %50 = dma.hbm_to_vmem [thread:$0]  %s46_s17, 128, %s48_s20, [#allocation6]  }
   0xe   :  { %s873_s23 = smov [#allocation10]  }
   0xf   :  { %s72_s24 = sshll.u32 %s873_s23, 4  ;;  %s73_s24 = int_to_ptr.vmem [resolvable:$true] %s72_s24 }
  0x10   :  { %78 = dma.hbm_to_vmem [thread:$0]  %s71_s0, 512, %s73_s24, [#allocation9], %s869_s1, %s869_s1, %s870_s14  }
  0x11   :  { %859 = dma.done.wait [#allocation3], 1024  }
  0x12   :  { %860 = vsyncadd [#allocation3], 4294966272 }
  0x13   :  { %861 = dma.done.wait [#allocation6], 256  }
  0x14   :  { %862 = vsyncadd [#allocation6], 4294967040 }
  0x15   :  { %863 = dma.done.wait [#allocation9], 1024  }
  0x16   :  { %864 = vsyncadd [#allocation9], 4294966272  ;;  %v112_v0 = vld [vmem:[#allocation8 + $0x18] sm:$0xff]  ;;  %v111_v2 = vld [vmem:[#allocation8 + $0x10] sm:$0xff]  ;;  %vm117_vm0 = vcmask 261120   ;;  %s629_s29 = sshll.u32 %s1123_s7, 4  ;;  %s630_s29 = int_to_ptr.hbm [resolvable:$true] %s629_s29 }
  0x17   :  { %v187_v1 = vld [vmem:[#allocation10 + $0x18] sm:$0xff]  ;;  %154 = vmatpush.msra.mxu0 %v112_v0  ;;  %658 = vmatpush.msra.mxu2 %v112_v0  ;;  %v186_v3 = vld [vmem:[#allocation10 + $0x10] sm:$0xff]  ;;  %v110_v4 = vld [vmem:[#allocation8 + $0x8] sm:$0xff] }
  0x18   :  { %659 = vmatpush.msra.mxu3 %v112_v0  ;;  %207 = vmatpush.msra.mxu1 %v187_v1  ;;  %v185_v5 = vld [vmem:[#allocation10 + $0x8] sm:$0xff]  ;;  %v109_v6 = vld [vmem:[#allocation8] sm:$0xff]  ;;  %v930_v8 = vld [vmem:[#allocation2] sm:$0xff] }
  0x19   :  { %155 = vmatpush.msra.mxu0 %v111_v2  ;;  %660 = vmatpush.msra.mxu2 %v111_v2  ;;  %v184_v7 = vld [vmem:[#allocation10] sm:$0xff]  ;;  %v934_v10 = vld [vmem:[#allocation2 + $0x28] sm:$0xff]  ;;  %v183_v11 = vld [vmem:[#allocation5] sm:$0xff] }
  0x1a   :  { %661 = vmatpush.msra.mxu3 %v111_v2  ;;  %208 = vmatpush.msra.mxu1 %v186_v3  ;;  %v932_v9 = vld [vmem:[#allocation2 + $0x10] sm:$0xff]  ;;  %v943_v12 = vld [vmem:[#allocation2 + $0x8] sm:$0xff]  ;;  %v945_v13 = vld [vmem:[#allocation2 + $0x18] sm:$0xff] }
  0x1b   :  { %156 = vmatpush.msra.mxu0 %v110_v4  ;;  %662 = vmatpush.msra.mxu2 %v110_v4  ;;  %v947_v14 = vld [vmem:[#allocation2 + $0x30] sm:$0xff]  ;;  %v955_v15 = vld [vmem:[#allocation2 + $0x20] sm:$0xff]  ;;  %v957_v16 = vld [vmem:[#allocation2 + $0x38] sm:$0xff] }
  0x1c   :  { %663 = vmatpush.msra.mxu3 %v110_v4  ;;  %209 = vmatpush.msra.mxu1 %v185_v5  ;;  %v678_v17 = vld [vmem:[%s1122_s6] ss:$0 sm:$0xff] }
  0x1d   :  { %157 = vmatpush.msra.mxu0 %v109_v6  ;;  %664 = vmatpush.msra.mxu2 %v109_v6  ;;  %v677_v18 = vld [vmem:[%s1120_s4] ss:$0 sm:$0xff]  ;;  %s874_s4 = smov [#allocation11]  }
  0x1e   :  { %665 = vmatpush.msra.mxu3 %v109_v6  ;;  %210 = vmatpush.msra.mxu1 %v184_v7  ;;  %s627_s6 = sshll.u32 %s874_s4, 4  ;;  %s628_s6 = int_to_ptr.vmem [resolvable:$true] %s627_s6 }
  0x1f   :  { %641 = vmatmul.msk.f32.vlgmr.msra.gmra.mxu0 %vm117_vm0, %v930_v8  ;;  %643 = vmatmul.msk.f32.vlgmr.msra.gmra.mxu2 %vm117_vm0, %v932_v9 }
  0x20   :  { %646 = vmatmul.msk.f32.vlgmr.msra.gmra.mxu3 %vm117_vm0, %v934_v10  ;;  %649 = vmatmul.msk.f32.vlgmr.msra.gmra.mxu1 %vm117_vm0, %v183_v11 }
  0x27   :  { %642 = vmatmul.msk.f32.gmra.mxu0 %vm117_vm0, %v943_v12  ;;  %644 = vmatmul.msk.f32.gmra.mxu2 %vm117_vm0, %v945_v13 }
  0x28   :  { %647 = vmatmul.msk.f32.gmra.mxu3 %vm117_vm0, %v947_v14 }
  0x2f   :  { %645 = vmatmul.msk.f32.gmra.mxu2 %vm117_vm0, %v955_v15 }
  0x30   :  { %648 = vmatmul.msk.f32.gmra.mxu3 %vm117_vm0, %v957_v16 }
  0x9c   :  { %v159_v19 = vpop.f32.mrf.mxu0 }
  0x9d   :  { %v212_v20 = vpop.f32.mrf.mxu1  ;;  %v160_v22 = vadd.f32 %v677_v18, %v159_v19 }
  0x9e   :  { %v213_v21 = vadd.f32 %v678_v17, %v212_v20 }
  0xa0   :  { %v217_v23 = vrot.slane %v213_v21, 2  ;;  %v220_v24 = vrot.slane %v213_v21, 5  ;;  %v216_v25 = vrot.slane %v213_v21, 1  ;;  %v223_v26 = vperm.slane %v213_v21, 0 }
  0xa1   :  { %v218_v38 = vrot.slane %v213_v21, 3  ;;  %v221_v40 = vrot.slane %v213_v21, 6  ;;  %v219_v57 = vrot.slane %v213_v21, 4  ;;  %v222_v60 = vrot.slane %v213_v21, 7 }
  0xa2   :  { %v165_v27 = vpop.f32.mrf.mxu2  ;;  %v225_v28 = vperm.slane %v217_v23, 0  ;;  %v228_v29 = vperm.slane %v220_v24, 0  ;;  %v224_v32 = vperm.slane %v216_v25, 0  ;;  %v239_v35 = vadd.f32 %v223_v26, %v160_v22 }
  0xa3   :  { %v166_v30 = vadd.f32 %v677_v18, %v165_v27  ;;  %v174_v31 = vpop.f32.mrf.mxu3  ;;  %v226_v46 = vperm.slane %v218_v38, 0  ;;  %v229_v48 = vperm.slane %v221_v40, 0  ;;  %v227_v3 = vperm.slane %v219_v57, 0 }
  0xa4   :  { %v175_v33 = vadd.f32 %v677_v18, %v174_v31  ;;  %v162_v34 = vpop.f32.mrf.mxu0  ;;  %v650_v41 = vmul.f32 -1.442695, %v239_v35  ;;  %v230_v7 = vperm.slane %v222_v60, 0 }
  0xa5   :  { %v241_v36 = vadd.f32 %v225_v28, %v166_v30  ;;  %v163_v37 = vadd.f32 %v677_v18, %v162_v34 }
  0xa6   :  { %v244_v39 = vadd.f32 %v228_v29, %v175_v33  ;;  %679 = vpow2.f32 %v650_v41 }
  0xa7   :  { %v652_v42 = vmul.f32 -1.442695, %v241_v36  ;;  %v240_v43 = vadd.f32 %v224_v32, %v163_v37 }
  0xa8   :  { %v655_v44 = vmul.f32 -1.442695, %v244_v39 }
  0xa9   :  { %681 = vpow2.f32 %v652_v42  ;;  %v651_v45 = vmul.f32 -1.442695, %v240_v43 }
  0xaa   :  { %683 = vpow2.f32 %v655_v44  ;;  %v168_v47 = vpop.f32.mrf.mxu2 }
  0xab   :  { %685 = vpow2.f32 %v651_v45  ;;  %v169_v49 = vadd.f32 %v677_v18, %v168_v47  ;;  %v177_v50 = vpop.f32.mrf.mxu3 }
  0xac   :  { %v178_v51 = vadd.f32 %v677_v18, %v177_v50  ;;  %v680_v53 = vpop.eup %679 }
  0xad   :  { %v242_v52 = vadd.f32 %v226_v46, %v169_v49  ;;  %v271_v1 = vadd.f32 1.0, %v680_v53 }
  0xae   :  { %v245_v54 = vadd.f32 %v229_v48, %v178_v51 }
  0xaf   :  { %v682_v55 = vpop.eup %681  ;;  %v653_v56 = vmul.f32 -1.442695, %v242_v52  ;;  %v290_v26 = vand.u32 2147483648, %v271_v1  ;;  %vm284_vm1 = vweird.f32 %v271_v1 }
  0xb0   :  { %v684_v58 = vpop.eup %683  ;;  %v273_v59 = vadd.f32 1.0, %v682_v55  ;;  %v656_v62 = vmul.f32 -1.442695, %v245_v54 }
  0xb1   :  { %v686_v61 = vpop.eup %685  ;;  %687 = vpow2.f32 %v653_v56  ;;  %v971_v5 = vadd.f32 1.0, %v684_v58  ;;  %v291_v39 = vor.u32 1.1754944e-38, %v290_v26 }
  0xb2   :  { %689 = vrcp.f32 %v273_v59  ;;  %v969_v63 = vadd.f32 1.0, %v686_v61  ;;  %v171_v0 = vpop.f32.mrf.mxu2  ;;  %v318_v29 = vand.u32 2147483647, %v273_v59  ;;  %v320_v33 = vand.u32 2147483648, %v273_v59 }
  0xb3   :  { %v172_v2 = vadd.f32 %v677_v18, %v171_v0  ;;  %v180_v4 = vpop.f32.mrf.mxu3  ;;  %vm314_vm4 = vweird.f32 %v273_v59 }
  0xb4   :  { %691 = vrcp.f32 %v969_v63  ;;  %v181_v6 = vadd.f32 %v677_v18, %v180_v4  ;;  %v288_v18 = vand.u32 2147483647, %v271_v1  ;;  %vm991_vm6 = vcmp.eq.f32.partialorder %v318_v29, 8.507059e+37 }
  0xb5   :  { %693 = vpow2.f32 %v656_v62  ;;  %v243_v11 = vadd.f32 %v227_v3, %v172_v2  ;;  %v321_v46 = vor.u32 1.1754944e-38, %v320_v33  ;;  %vm299_vm8 = vweird.f32 %v969_v63 }
  0xb6   :  { %v246_v17 = vadd.f32 %v230_v7, %v181_v6  ;;  %695 = vrcp.f32 %v271_v1  ;;  %vm987_vm3 = vcmp.eq.f32.partialorder %v288_v18, 8.507059e+37  ;;  %v305_v51 = vand.u32 2147483648, %v969_v63 }
  0xb7   :  { %v688_v19 = vpop.eup %687  ;;  %v654_v20 = vmul.f32 -1.442695, %v243_v11  ;;  %697 = vrcp.f32 %v971_v5  ;;  %v303_v6 = vand.u32 2147483647, %v969_v63  ;;  %v363_v7 = vand.u32 2147483647, %v971_v5 }
  0xb8   :  { %v690_v21 = vpop.eup %689  ;;  %v975_v22 = vadd.f32 1.0, %v688_v19  ;;  %v657_v23 = vmul.f32 -1.442695, %v246_v17 }
  0xb9   :  { %699 = vpow2.f32 %v654_v20  ;;  %v310_v24 = vmul.f32 %v690_v21, %v273_v59  ;;  %vm315_vm2 = vweird.f32 %v690_v21 }
  0xba   :  { %v977_v25 = vpop.eup %691  ;;  %701 = vrcp.f32 %v975_v22  ;;  %vm316_vm7 = vmor %vm314_vm4, %vm315_vm2  ;;  %v333_v56 = vand.u32 2147483647, %v975_v22  ;;  %v335_v60 = vand.u32 2147483648, %v975_v22  ;;  %vm329_vm13 = vweird.f32 %v975_v22 }
  0xbb   :  { %v694_v27 = vpop.eup %693  ;;  %703 = vpow2.f32 %v657_v23  ;;  %v311_v28 = vsub.f32 1.0, %v310_v24  ;;  %v295_v30 = vmul.f32 %v977_v25, %v969_v63  ;;  %vm300_vm10 = vweird.f32 %v977_v25 }
  0xbc   :  { %v696_v31 = vpop.eup %695  ;;  %v982_v32 = vadd.f32 1.0, %v694_v27  ;;  %vm1033_vm12 = vmor %vm299_vm8, %vm300_vm10  ;;  %v306_v24 = vor.u32 1.1754944e-38, %v305_v51  ;;  %v336_v18 = vor.u32 1.1754944e-38, %v335_v60  ;;  %vm334_vm15 = vcmp.eq.f32.partialorder %v333_v56, 8.507059e+37 }
  0xbd   :  { %v280_v34 = vmul.f32 %v696_v31, %v271_v1  ;;  %v312_v35 = vmul.f32 %v690_v21, %v311_v28  ;;  %v296_v36 = vsub.f32 1.0, %v295_v30  ;;  %v984_v37 = vpop.eup %697  ;;  %vm285_vm5 = vweird.f32 %v696_v31 }
  0xbe   :  { %705 = vrcp.f32 %v982_v32  ;;  %vm1006_vm9 = vmor %vm284_vm1, %vm285_vm5  ;;  %v355_v0 = vmul.f32 %v984_v37, %v971_v5  ;;  %vm359_vm1 = vweird.f32 %v971_v5  ;;  %vm304_vm2 = vcmp.eq.f32.partialorder %v303_v6, 8.507059e+37 }
  0xbf   :  { %v700_v40 = vpop.eup %699  ;;  %v281_v41 = vsub.f32 1.0, %v280_v34  ;;  %v313_v42 = vadd.f32 %v690_v21, %v312_v35  ;;  %v297_v47 = vmul.f32 %v977_v25, %v296_v36  ;;  %v378_v30 = vand.u32 2147483647, %v982_v32 }
  0xc0   :  { %v702_v44 = vpop.eup %701  ;;  %v995_v45 = vadd.f32 1.0, %v700_v40  ;;  %v356_v26 = vsub.f32 1.0, %v355_v0  ;;  %v380_v43 = vand.u32 2147483648, %v982_v32 }
  0xc1   :  { %v704_v48 = vpop.eup %703  ;;  %v282_v49 = vmul.f32 %v696_v31, %v281_v41  ;;  %v317_v50 = vsel %vm316_vm7, %v690_v21, %v313_v42  ;;  %v325_v52 = vmul.f32 %v702_v44, %v975_v22  ;;  %v298_v62 = vadd.f32 %v977_v25, %v297_v47 }
  0xc2   :  { %707 = vrcp.f32 %v995_v45  ;;  %v1002_v53 = vadd.f32 1.0, %v704_v48  ;;  %v322_v55 = vsel %vm991_vm6, %v321_v46, %v317_v50  ;;  %vm330_vm11 = vweird.f32 %v702_v44 }
  0xc3   :  { %v283_v57 = vadd.f32 %v696_v31, %v282_v49  ;;  %v405_v58 = vsel %vm117_vm0, %v322_v55, 0.0  ;;  %v326_v59 = vsub.f32 1.0, %v325_v52  ;;  %v302_v23 = vsel %vm1033_vm12, %v977_v25, %v298_v62  ;;  %vm331_vm14 = vmor %vm329_vm13, %vm330_vm11 }
  0xc4   :  { %v1015_v61 = vpop.eup %705  ;;  %709 = vrcp.f32 %v1002_v53  ;;  %406 = vadd.xlane.f32.xlu1 %v405_v58  ;;  %v307_v25 = vsel %vm304_vm2, %v306_v24, %v302_v23  ;;  %v348_v35 = vand.u32 2147483647, %v995_v45  ;;  %v350_v36 = vand.u32 2147483648, %v995_v45 }
  0xc5   :  { %v287_v1 = vsel %vm1006_vm9, %v696_v31, %v283_v57  ;;  %v327_v2 = vmul.f32 %v702_v44, %v326_v59  ;;  %v370_v3 = vmul.f32 %v1015_v61, %v982_v32  ;;  %vm375_vm4 = vweird.f32 %v1015_v61 }
  0xc6   :  { %v292_v4 = vsel %vm987_vm3, %v291_v39, %v287_v1  ;;  %vm374_vm3 = vweird.f32 %v982_v32  ;;  %v357_v38 = vmul.f32 %v984_v37, %v356_v26  ;;  %v402_v42 = vsel %vm117_vm0, %v307_v25, 0.0 }
  0xc7   :  { %v399_v11 = vsel %vm117_vm0, %v292_v4, 0.0  ;;  %v328_v19 = vadd.f32 %v702_v44, %v327_v2  ;;  %v371_v20 = vsub.f32 1.0, %v370_v3  ;;  %vm344_vm6 = vweird.f32 %v995_v45  ;;  %vm1059_vm7 = vmor %vm374_vm3, %vm375_vm4 }
  0xc8   :  { %v708_v21 = vpop.eup %707  ;;  %400 = vadd.xlane.f32.xlu0 %v399_v11  ;;  %v393_v49 = vand.u32 2147483647, %v1002_v53  ;;  %vm349_vm10 = vcmp.eq.f32.partialorder %v348_v35, 8.507059e+37  ;;  %v351_v50 = vor.u32 1.1754944e-38, %v350_v36  ;;  %vm389_vm11 = vweird.f32 %v1002_v53 }
  0xc9   :  { %v332_v27 = vsel %vm331_vm14, %v702_v44, %v328_v19  ;;  %v372_v63 = vmul.f32 %v1015_v61, %v371_v20  ;;  %v340_v28 = vmul.f32 %v708_v21, %v995_v45  ;;  %vm345_vm5 = vweird.f32 %v708_v21 }
  0xca   :  { %v710_v22 = vpop.eup %709  ;;  %v337_v29 = vsel %vm334_vm15, %v336_v18, %v332_v27  ;;  %v395_v44 = vand.u32 2147483648, %v1002_v53  ;;  %vm346_vm9 = vmor %vm344_vm6, %vm345_vm5  ;;  %vm360_vm12 = vweird.f32 %v984_v37  ;;  %v358_v52 = vadd.f32 %v984_v37, %v357_v38 }
  0xcb   :  { %v408_v31 = vsel %vm117_vm0, %v337_v29, 0.0  ;;  %v341_v33 = vsub.f32 1.0, %v340_v28  ;;  %v385_v34 = vmul.f32 %v710_v22, %v1002_v53  ;;  %v373_v39 = vadd.f32 %v1015_v61, %v372_v63  ;;  %vm361_vm2 = vmor %vm359_vm1, %vm360_vm12 }
  0xcc   :  { %409 = vadd.xlane.f32.xlu1 %v408_v31  ;;  %vm390_vm8 = vweird.f32 %v710_v22  ;;  %v381_v54 = vor.u32 1.1754944e-38, %v380_v43  ;;  %v396_v56 = vor.u32 1.1754944e-38, %v395_v44  ;;  %v365_v57 = vand.u32 2147483648, %v971_v5 }
  0xcd   :  { %v342_v40 = vmul.f32 %v708_v21, %v341_v33  ;;  %v386_v41 = vsub.f32 1.0, %v385_v34  ;;  %v377_v32 = vsel %vm1059_vm7, %v1015_v61, %v373_v39  ;;  %vm391_vm13 = vmor %vm389_vm11, %vm390_vm8  ;;  %vm379_vm14 = vcmp.eq.f32.partialorder %v378_v30, 8.507059e+37 }
  0xce   :  { %vm394_vm15 = vcmp.eq.f32.partialorder %v393_v49, 8.507059e+37  ;;  %v382_v59 = vsel %vm379_vm14, %v381_v54, %v377_v32  ;;  %v362_v62 = vsel %vm361_vm2, %v984_v37, %v358_v52  ;;  %v366_v0 = vor.u32 1.1754944e-38, %v365_v57 }
  0xcf   :  { %v343_v47 = vadd.f32 %v708_v21, %v342_v40  ;;  %v387_v48 = vmul.f32 %v710_v22, %v386_v41  ;;  %v417_v1 = vsel %vm117_vm0, %v382_v59, 0.0  ;;  %vm364_vm3 = vcmp.eq.f32.partialorder %v363_v7, 8.507059e+37 }
  0xd0   :  { %403 = vadd.xlane.f32.xlu0 %v402_v42  ;;  %v367_v2 = vsel %vm364_vm3, %v366_v0, %v362_v62  ;;  %v433_v11 = vlaneseq  ;;  %vm443_vm1 = vcmask 1041409   ;;  %vm445_vm4 = vcmask 1042434  }
  0xd1   :  { %v347_v45 = vsel %vm346_vm9, %v708_v21, %v343_v47  ;;  %v388_v51 = vadd.f32 %v710_v22, %v387_v48  ;;  %v414_v3 = vsel %vm117_vm0, %v367_v2, 0.0  ;;  %vm447_vm5 = vcmask 1043459  }
  0xd2   :  { %v352_v55 = vsel %vm349_vm10, %v351_v50, %v347_v45  ;;  %v434_v20 = vand.u32 127, %v433_v11  ;;  %vm449_vm6 = vcmask 1044484   ;;  %vm451_vm7 = vcmask 1045509  }
  0xd3   :  { %v411_v58 = vsel %vm117_vm0, %v352_v55, 0.0  ;;  %v392_v53 = vsel %vm391_vm13, %v710_v22, %v388_v51  ;;  %v423_v22 = vld [vmem:[#allocation7] sm:$0xff]  ;;  %vm453_vm8 = vcmask 1046534   ;;  %vm455_vm9 = vcmask 1047559  }
  0xd4   :  { %412 = vadd.xlane.f32.xlu2 %v411_v58  ;;  %v397_v60 = vsel %vm394_vm15, %v396_v56, %v392_v53  ;;  %vm424_vm10 = vcmp.ne.s32.totalorder %v423_v22, 0  ;;  %vm459_vm11 = vcmask 64512   ;;  %v487_v46 = vshrl.u32 %v433_v11, 7 }
  0xd5   :  { %v420_v61 = vsel %vm117_vm0, %v397_v60, 0.0 }
  0xd6   :  { %421 = vadd.xlane.f32.xlu1 %v420_v61  ;;  %676 = vset.pattern.permute.xlu0 %v487_v46 }
  0xd7   :  { %675 = vset.pattern.permute.xlu2 %v487_v46  ;;  %674 = vset.pattern.permute.xlu1 %v487_v46 }
  0xd8   :  { %418 = vadd.xlane.f32.xlu0 %v417_v1 }
  0xdc   :  { %415 = vadd.xlane.f32.xlu2 %v414_v3 }
 0x137   :  { %v407_v6 = vpop.xlane.xlu1 %406 }
 0x138   :  { %v437_v7 = vperm.slane %v407_v6, %v434_v20 }
 0x13b   :  { %v401_v4 = vpop.xlane.xlu0 %400 }
 0x13c   :  { %v435_v23 = vperm.slane %v401_v4, %v434_v20 }
 0x13f   :  { %v410_v19 = vpop.xlane.xlu1 %409 }
 0x140   :  { %v438_v5 = vperm.slane %v410_v19, %v434_v20 }
 0x143   :  { %v404_v17 = vpop.xlane.xlu0 %403 }
 0x144   :  { %v436_v37 = vperm.slane %v404_v17, %v434_v20 }
 0x146   :  { %v444_v24 = vsel %vm443_vm1, %v436_v37, %v435_v23 }
 0x147   :  { %v413_v21 = vpop.xlane.xlu2 %412  ;;  %v446_v27 = vsel %vm445_vm4, %v437_v7, %v444_v24 }
 0x148   :  { %v439_v18 = vperm.slane %v413_v21, %v434_v20  ;;  %v448_v29 = vsel %vm447_vm5, %v438_v5, %v446_v27 }
 0x149   :  { %v422_v63 = vpop.xlane.xlu1 %421 }
 0x14a   :  { %v450_v31 = vsel %vm449_vm6, %v439_v18, %v448_v29  ;;  %v442_v33 = vperm.slane %v422_v63, %v434_v20 }
 0x14b   :  { %v419_v26 = vpop.xlane.xlu0 %418 }
 0x14c   :  { %v441_v25 = vperm.slane %v419_v26, %v434_v20 }
 0x14f   :  { %v416_v28 = vpop.xlane.xlu2 %415 }
 0x150   :  { %v440_v30 = vperm.slane %v416_v28, %v434_v20 }
 0x152   :  { %v452_v34 = vsel %vm451_vm7, %v440_v30, %v450_v31 }
 0x153   :  { %v454_v35 = vsel %vm453_vm8, %v441_v25, %v452_v34 }
 0x154   :  { %v456_v36 = vsel %vm455_vm9, %v442_v33, %v454_v35 }
 0x155   :  { %v458_v38 = vsel %vm424_vm10, -1e+09, %v456_v36 }
 0x156   :  { %v460_v39 = vsel %vm459_vm11, %v458_v38, -inf }
 0x157   :  { %461 = vmax.xlane.f32.xlu2 %v460_v39 }
 0x1ca   :  { %v462_v40 = vpop.xlane.xlu2 %461 }
 0x1cb   :  { %v463_v41 = vsub.f32 %v458_v38, %v462_v40 }
 0x1cd   :  { %v464_v42 = vmul.f32 1.442695, %v463_v41 }
 0x1cf   :  { %711 = vpow2.f32 %v464_v42 }
 0x1d5   :  { %v712_v43 = vpop.eup %711 }
 0x1d6   :  { %v466_v44 = vsel %vm459_vm11, %v712_v43, 0.0 }
 0x1d7   :  { %467 = vadd.xlane.f32.xlu0 %v466_v44 }
 0x24a   :  { %v468_v47 = vpop.xlane.xlu0 %467 }
 0x24b   :  { %713 = vrcp.f32 %v468_v47  ;;  %v480_v32 = vand.u32 2147483648, %v468_v47  ;;  %v478_v51 = vand.u32 2147483647, %v468_v47  ;;  %vm474_vm13 = vweird.f32 %v468_v47 }
 0x24d   :  { %v481_v54 = vor.u32 1.1754944e-38, %v480_v32  ;;  %vm479_vm15 = vcmp.eq.f32.partialorder %v478_v51, 8.507059e+37 }
 0x251   :  { %v714_v48 = vpop.eup %713 }
 0x252   :  { %v470_v49 = vmul.f32 %v714_v48, %v468_v47  ;;  %vm475_vm12 = vweird.f32 %v714_v48 }
 0x253   :  { %vm476_vm14 = vmor %vm474_vm13, %vm475_vm12 }
 0x254   :  { %v471_v50 = vsub.f32 1.0, %v470_v49 }
 0x256   :  { %v472_v45 = vmul.f32 %v714_v48, %v471_v50 }
 0x258   :  { %v473_v52 = vadd.f32 %v714_v48, %v472_v45 }
 0x25a   :  { %v477_v55 = vsel %vm476_vm14, %v714_v48, %v473_v52 }
 0x25b   :  { %v482_v56 = vsel %vm479_vm15, %v481_v54, %v477_v55 }
 0x25c   :  { %v484_v57 = vmul.f32 %v712_v43, %v482_v56 }
 0x25e   :  { %v499_v58 = vperm.slane %v484_v57, 2  ;;  %v492_v53 = vperm.slane %v484_v57, 1  ;;  %v485_v59 = vperm.slane %v484_v57, 0  ;;  %v506_v60 = vperm.slane %v484_v57, 3 }
 0x25f   :  { %v513_v61 = vperm.slane %v484_v57, 4  ;;  %v520_v62 = vperm.slane %v484_v57, 5  ;;  %v527_v0 = vperm.slane %v484_v57, 6  ;;  %v534_v1 = vperm.slane %v484_v57, 7 }
 0x260   :  { %504 = vperm.xlu0 %676, %v499_v58   ;;  %497 = vperm.xlu2 %675, %v492_v53  }
 0x261   :  { %490 = vperm.xlu1 %674, %v485_v59  }
 0x268   :  { %511 = vperm.xlu2 %675, %v506_v60  }
 0x269   :  { %518 = vperm.xlu1 %674, %v513_v61  }
 0x270   :  { %525 = vperm.xlu2 %675, %v520_v62  }
 0x271   :  { %532 = vperm.xlu1 %674, %v527_v0  }
 0x278   :  { %539 = vperm.xlu2 %675, %v534_v1  }
 0x2ba   :  { %v498_v2 = vpop.permute.xlu2 %497 }
 0x2bb   :  { %v542_v6 = vmul.f32 %v498_v2, %v943_v12 }
 0x2bd   :  { %v556_v11 = vsel %vm117_vm0, %v542_v6, 0.0 }
 0x2be   :  { %v557_v19 = vrot.slane %v556_v11, 4 }
 0x2c0   :  { %v558_v26 = vadd.f32 %v557_v19, %v556_v11 }
 0x2c2   :  { %v512_v3 = vpop.permute.xlu2 %511  ;;  %v559_v30 = vrot.slane %v558_v26, 2 }
 0x2c3   :  { %v544_v17 = vmul.f32 %v512_v3, %v945_v13 }
 0x2c4   :  { %v560_v38 = vadd.f32 %v559_v30, %v558_v26 }
 0x2c5   :  { %v570_v5 = vsel %vm117_vm0, %v544_v17, 0.0 }
 0x2c6   :  { %v571_v28 = vrot.slane %v570_v5, 4  ;;  %v561_v47 = vrot.slane %v560_v38, 1 }
 0x2c8   :  { %v572_v33 = vadd.f32 %v571_v28, %v570_v5  ;;  %v562_v55 = vadd.f32 %v561_v47, %v560_v38 }
 0x2ca   :  { %v526_v4 = vpop.permute.xlu2 %525  ;;  %v573_v42 = vrot.slane %v572_v33, 2 }
 0x2cb   :  { %v546_v7 = vmul.f32 %v526_v4, %v934_v10 }
 0x2cc   :  { %v574_v45 = vadd.f32 %v573_v42, %v572_v33 }
 0x2ce   :  { %v575_v60 = vrot.slane %v574_v45, 1 }
 0x2d0   :  { %v576_v6 = vadd.f32 %v575_v60, %v574_v45 }
 0x2d2   :  { %v505_v20 = vpop.permute.xlu0 %504  ;;  %v540_v23 = vpop.permute.xlu2 %539 }
 0x2d3   :  { %v543_v21 = vmul.f32 %v505_v20, %v932_v9  ;;  %v491_v37 = vpop.permute.xlu1 %490  ;;  %v548_v13 = vmul.f32 %v540_v23, %v957_v16  ;;  %v584_v9 = vsel %vm117_vm0, %v546_v7, 0.0 }
 0x2d4   :  { %v541_v24 = vmul.f32 %v491_v37, %v930_v8  ;;  %v585_v34 = vrot.slane %v584_v9, 4 }
 0x2d5   :  { %v563_v18 = vsel %vm117_vm0, %v543_v21, 0.0  ;;  %v598_v25 = vsel %vm117_vm0, %v548_v13, 0.0 }
 0x2d6   :  { %v564_v12 = vrot.slane %v563_v18, 4  ;;  %v549_v27 = vsel %vm117_vm0, %v541_v24, 0.0  ;;  %v599_v39 = vrot.slane %v598_v25, 4  ;;  %v586_v43 = vadd.f32 %v585_v34, %v584_v9 }
 0x2d7   :  { %v550_v63 = vrot.slane %v549_v27, 4 }
 0x2d8   :  { %v565_v22 = vadd.f32 %v564_v12, %v563_v18  ;;  %v600_v48 = vadd.f32 %v599_v39, %v598_v25  ;;  %v587_v51 = vrot.slane %v586_v43, 2 }
 0x2d9   :  { %v551_v29 = vadd.f32 %v550_v63, %v549_v27 }
 0x2da   :  { %v566_v8 = vrot.slane %v565_v22, 2  ;;  %v601_v56 = vrot.slane %v600_v48, 2  ;;  %v588_v61 = vadd.f32 %v587_v51, %v586_v43 }
 0x2db   :  { %v552_v31 = vrot.slane %v551_v29, 2  ;;  %v519_v10 = vpop.permute.xlu1 %518 }
 0x2dc   :  { %v545_v35 = vmul.f32 %v519_v10, %v955_v15  ;;  %v567_v40 = vadd.f32 %v566_v8, %v565_v22  ;;  %v602_v1 = vadd.f32 %v601_v56, %v600_v48 }
 0x2dd   :  { %v553_v36 = vadd.f32 %v552_v31, %v551_v29 }
 0x2de   :  { %v577_v16 = vsel %vm117_vm0, %v545_v35, 0.0  ;;  %v568_v49 = vrot.slane %v567_v40, 1  ;;  %v603_v17 = vrot.slane %v602_v1, 1 }
 0x2df   :  { %v578_v41 = vrot.slane %v577_v16, 4  ;;  %v554_v44 = vrot.slane %v553_v36, 1 }
 0x2e0   :  { %v569_v58 = vadd.f32 %v568_v49, %v567_v40  ;;  %v604_v24 = vadd.f32 %v603_v17, %v602_v1 }
 0x2e1   :  { %v579_v46 = vadd.f32 %v578_v41, %v577_v16  ;;  %v555_v52 = vadd.f32 %v554_v44, %v553_v36 }
 0x2e3   :  { %v580_v50 = vrot.slane %v579_v46, 2  ;;  %v533_v32 = vpop.permute.xlu1 %532  ;;  %v613_v62 = vsel %vm443_vm1, %v562_v55, %v555_v52 }
 0x2e4   :  { %v547_v15 = vmul.f32 %v533_v32, %v947_v14  ;;  %v614_v2 = vsel %vm445_vm4, %v569_v58, %v613_v62  ;;  %v589_v14 = vrot.slane %v588_v61, 1 }
 0x2e5   :  { %v581_v54 = vadd.f32 %v580_v50, %v579_v46  ;;  %v615_v19 = vsel %vm447_vm5, %v576_v6, %v614_v2 }
 0x2e6   :  { %v591_v57 = vsel %vm117_vm0, %v547_v15, 0.0  ;;  %v590_v37 = vadd.f32 %v589_v14, %v588_v61 }
 0x2e7   :  { %v582_v53 = vrot.slane %v581_v54, 1  ;;  %v592_v59 = vrot.slane %v591_v57, 4 }
 0x2e9   :  { %v593_v0 = vadd.f32 %v592_v59, %v591_v57  ;;  %v583_v3 = vadd.f32 %v582_v53, %v581_v54 }
 0x2eb   :  { %v594_v4 = vrot.slane %v593_v0, 2  ;;  %v616_v20 = vsel %vm449_vm6, %v583_v3, %v615_v19 }
 0x2ec   :  { %v617_v5 = vsel %vm451_vm7, %v590_v37, %v616_v20 }
 0x2ed   :  { %v595_v11 = vadd.f32 %v594_v4, %v593_v0 }
 0x2ef   :  { %v596_v21 = vrot.slane %v595_v11, 1 }
 0x2f1   :  { %v597_v23 = vadd.f32 %v596_v21, %v595_v11 }
 0x2f3   :  { %v618_v7 = vsel %vm453_vm8, %v597_v23, %v617_v5 }
 0x2f4   :  { %v619_v18 = vsel %vm455_vm9, %v604_v24, %v618_v7 }
 0x2f5   :  { %621 = vst.msk [vmem:[#allocation11] sm:$0xff] %vm117_vm0, %v619_v18 }
 0x2f6   :  { %632 = dma.vmem_to_hbm [thread:$0]  %s628_s6, 128, %s630_s29, [#allocation4]  }
 0x2f7   :  { %865 = dma.done.wait [#allocation4], 128  }
 0x2f8   :  { %866 = vsyncadd [#allocation4], 4294967168 }
 0x2f9   :  { %637 = vsyncpa [#allocation3], 1 }
 0x2fa   :  { %638 = vsyncpa [#allocation6], 1 }
 0x2fb   :  { %639 = vsyncpa [#allocation9], 1 }
 0x2fc   :  { %640 = vsyncpa [#allocation4], 1 }

</bundles_post_ra>
